<compile_context>
chip_gen: v7x
topology: tpu7x:2x2x1
jax: 0.10.0
libtpu: 0.0.40
codegen_flags: <defaults>
</compile_context>

<pallas_src>
import functools

import jax
import jax.numpy as jnp
from jax.experimental import pallas as pl
from jax.experimental.pallas import tpu as pltpu

# ----------------------------- configuration ---------------------------------
BATCH = 2
C_IN = 4
C_OUT = 8
H = W = 16
HW = H * W
NUM_EXPERTS = 16
K_TOP = 4
KH = KW = 3                   # kernel_size=3, stride=1, padding=1
K_RAW = KH * KW * C_IN        # 36 im2col features
K_PAD = 48                    # pad contraction to a multiple of 16 (bf16 sublane pack)
NOISE_EPS = 0.01
LOSS_COEF = 0.01

# Batch tile folded into the matmul N dimension. For the toy B=2 forward the
# whole batch goes into one grid step (N = 512 lanes, a single MXU pass). For
# realistic batch sizes keep the bf16 patch tile (K_PAD * B_TILE * HW * 2 B,
# double-buffered) well inside v7x's 64 MiB VMEM; the grid over batch tiles is
# marked "parallel" so it shards across v7x's two TensorCores (no-op on v5e/v6e).
B_TILE = BATCH


# ---------- Pallas kernel: shared-expert conv (im2col matmul) + combine ------
def _conv_combine_kernel(patches_ref, w2_ref, b_ref, scale_ref, o_ref):
    """One bf16 MXU matmul over the whole batch tile + f32 epilogue.

    patches_ref : VMEM (K_PAD, B_TILE*HW)  bf16  im2col patches, batch folded into lanes
    w2_ref      : VMEM (C_OUT, K_PAD)      bf16  conv weight as matmul LHS (K zero-padded)
    b_ref       : VMEM (C_OUT, 1)          f32   conv bias (broadcast once over lanes)
    scale_ref   : VMEM (1, B_TILE*HW)      f32   per-example gate-sum, lane-dense
    o_ref       : VMEM (C_OUT, B_TILE*HW)  f32
    """
    acc = jnp.dot(w2_ref[...], patches_ref[...],
                  preferred_element_type=jnp.float32)          # (C_OUT, B_TILE*HW)
    o_ref[...] = ((acc + b_ref[...]) * scale_ref[...]).astype(o_ref.dtype)


def conv_combine(patches, w2, bias, scale):
    k_pad, n_total = patches.shape
    c_out = w2.shape[0]
    n_tile = B_TILE * HW
    grid = (pl.cdiv(n_total, n_tile),)

    # Per-tile VMEM budget (double-buffered in/out) + headroom; explicit so the
    # same code is safe under v7x's 64 MiB physical / 32 MiB scoped default.
    tile_bytes = (k_pad * n_tile * 2      # patches (bf16)
                  + c_out * n_tile * 4    # output  (f32)
                  + n_tile * 4            # scale   (f32)
                  + c_out * k_pad * 2     # w2      (bf16)
                  + c_out * 4)            # bias    (f32)
    vmem_limit = int(max(4 << 20, 4 * tile_bytes))

    return pl.pallas_call(
        _conv_combine_kernel,
        out_shape=jax.ShapeDtypeStruct((c_out, n_total), jnp.float32),
        grid_spec=pltpu.PrefetchScalarGridSpec(
            num_scalar_prefetch=0,
            grid=grid,
            in_specs=[
                pl.BlockSpec((k_pad, n_tile), lambda i: (0, i)),   # patches tile
                pl.BlockSpec((c_out, k_pad), lambda i: (0, 0)),    # w2 (replicated)
                pl.BlockSpec((c_out, 1), lambda i: (0, 0)),        # bias (replicated)
                pl.BlockSpec((1, n_tile), lambda i: (0, i)),       # gate scale tile
            ],
            out_specs=pl.BlockSpec((c_out, n_tile), lambda i: (0, i)),
        ),
        compiler_params=pltpu.CompilerParams(
            dimension_semantics=("parallel",),
            vmem_limit_bytes=vmem_limit),
    )(patches, w2, bias, scale)


# ------------------------------ im2col (wrapper) ------------------------------
def im2col_nchw_padded(x_nchw):
    """(B, C, H, W) -> (K_PAD, B*H*W).

    Row index = (kh*KW + kw)*C + c (rows [K_RAW:K_PAD] are zero padding), column
    index = b*H*W + h*W + w (batch folded into the lane dimension).
    TODO(synk): at real sizes synthesize the 9 taps in-kernel (shifted pl.ds /
    pltpu.roll over a padded image tile) to avoid the ~9x HBM read blowup of a
    materialized im2col; at B=2 the wrapper form is fused by XLA and is cheapest.
    """
    b, c, h, w = x_nchw.shape
    x_pad = jnp.pad(x_nchw, ((0, 0), (0, 0), (1, 1), (1, 1)))     # padding=1
    taps = [x_pad[:, :, kh:kh + h, kw:kw + w]
            for kh in range(KH) for kw in range(KW)]              # 9 x (B, C, H, W)
    p = jnp.stack(taps, axis=0)                                   # (9, B, C, H, W)
    p = jnp.transpose(p, (0, 2, 1, 3, 4)).reshape(KH * KW * c, b * h * w)
    return jnp.pad(p, ((0, K_PAD - KH * KW * c), (0, 0)))


# ----------------------------- gating (glue JAX) ------------------------------
def cv_squared(x):
    eps = 1e-10
    if x.shape[0] == 1:
        return jnp.zeros((), jnp.float32)
    xf = x.astype(jnp.float32)
    return jnp.var(xf, ddof=1) / (jnp.mean(xf) ** 2 + eps)


def _prob_in_top_k(clean_values, noisy_values, noise_stddev, noisy_top_values, k):
    # NOTE: matches the PyTorch reference exactly, including the fact that
    # clean/noisy logits are pre-softmax while noisy_top_values are post-softmax.
    batch = clean_values.shape[0]
    m = noisy_top_values.shape[1]
    flat = noisy_top_values.reshape(-1)
    pos_if_in = jnp.arange(batch) * m + k
    thr_if_in = flat[pos_if_in][:, None]
    is_in = noisy_values > thr_if_in
    thr_if_out = flat[pos_if_in - 1][:, None]
    prob_if_in = jax.scipy.stats.norm.cdf((clean_values - thr_if_in) / noise_stddev)
    prob_if_out = jax.scipy.stats.norm.cdf((clean_values - thr_if_out) / noise_stddev)
    return jnp.where(is_in, prob_if_in, prob_if_out)


def noisy_top_k_gating(gate_x, w_gate, w_noise, key, train,
                       noisy_gating=True, k=K_TOP, num_experts=NUM_EXPERTS,
                       noise_epsilon=NOISE_EPS):
    clean_logits = gate_x @ w_gate
    if noisy_gating and train:
        raw_noise_stddev = gate_x @ w_noise
        noise_stddev = jax.nn.softplus(raw_noise_stddev) + noise_epsilon
        noise = jax.random.normal(key, clean_logits.shape, clean_logits.dtype)
        noisy_logits = clean_logits + noise * noise_stddev
        logits = noisy_logits
    else:
        logits = clean_logits
    logits = jax.nn.softmax(logits / 100.0, axis=1)

    m = min(k + 1, num_experts)
    top_logits, top_indices = jax.lax.top_k(logits, m)
    top_k_logits = top_logits[:, :k]
    top_k_indices = top_indices[:, :k]
    top_k_gates = top_k_logits / (jnp.sum(top_k_logits, axis=1, keepdims=True) + 1e-6)

    batch = logits.shape[0]
    gates = jnp.zeros_like(logits).at[
        jnp.arange(batch)[:, None], top_k_indices].set(top_k_gates)

    if noisy_gating and k < num_experts and train:
        load = _prob_in_top_k(clean_logits, noisy_logits, noise_stddev,
                              top_logits, k).sum(axis=0)
    else:
        load = (gates > 0).sum(axis=0)
    return gates, load


# ----------------------------- full forward -----------------------------------
@functools.partial(jax.jit, static_argnames=("train",))
def moe_kan_conv_forward(x_nchw, params, noise_key, train=True,
                         loss_coef=LOSS_COEF):
    b, c, h, w = x_nchw.shape

    # gate_x = flatten(AdaptiveAvgPool2d(x), 1) -- plain JAX, fuses into gating matmul.
    gate_x = jnp.mean(x_nchw, axis=(2, 3))                          # (B, C_in)

    gates, load = noisy_top_k_gating(gate_x, params["w_gate"], params["w_noise"],
                                     noise_key, train)
    importance = gates.sum(axis=0)
    loss = (cv_squared(importance) + cv_squared(load)) * loss_coef

    # All experts share identical weights (module copies expert[0]'s state_dict),
    # so dispatch -> expert conv -> combine == per-example gate-sum scaling.
    # NOTE: invalid if expert parameters ever diverge (training of experts).
    gate_sum = gates.sum(axis=1).astype(jnp.float32)                # (B,)
    # Lane-dense per-example scale aligned with the batch-folded lane dimension.
    scale = jnp.repeat(gate_sum, h * w).reshape(1, b * h * w)       # (1, B*HW) f32

    # im2col + K-pad in the wrapper; bf16 MXU inputs, f32 accumulation in-kernel.
    patches = im2col_nchw_padded(x_nchw).astype(jnp.bfloat16)       # (K_PAD, B*HW)

    # Torch conv weight (C_OUT, C_IN, KH, KW) -> (C_OUT, K_PAD) matching the
    # patch row order (kh*KW + kw)*C_IN + c_in, with zero-padded K.
    w2 = jnp.transpose(params["w_conv"], (0, 2, 3, 1)).reshape(C_OUT, K_RAW)
    w2 = jnp.pad(w2, ((0, 0), (0, K_PAD - K_RAW))).astype(jnp.bfloat16)
    bias = params["b_conv"].reshape(C_OUT, 1).astype(jnp.float32)

    y_flat = conv_combine(patches, w2, bias, scale)                 # (C_OUT, B*HW)
    # Lane dim is b*HW + hw -> cheap wrapper-side layout plumbing back to NCHW.
    y = jnp.transpose(y_flat.reshape(C_OUT, b, h, w), (1, 0, 2, 3))
    return y, loss


# ----------------------------- parameter setup --------------------------------
def init_params(key):
    # Gating parameters: torch.zeros(input_size, num_experts) in the module.
    w_gate = jnp.zeros((C_IN, NUM_EXPERTS), jnp.float32)
    w_noise = jnp.zeros((C_IN, NUM_EXPERTS), jnp.float32)
    # Shared expert conv weights, torch OIHW layout.
    # TODO(synk): the KAN conv_class internals (spline/RBF feature expansions)
    # are not provided in the reference snippet; a standard Conv2d expert
    # (shared across all experts, as the module enforces) stands in.
    k1, k2 = jax.random.split(key)
    w_conv = jax.random.normal(k1, (C_OUT, C_IN, KH, KW), jnp.float32) * 0.1
    b_conv = jax.random.normal(k2, (C_OUT,), jnp.float32) * 0.1
    return {"w_gate": w_gate, "w_noise": w_noise,
            "w_conv": w_conv, "b_conv": b_conv}


if __name__ == "__main__":
    root = jax.random.PRNGKey(0)
    k_param, k_input, k_noise = jax.random.split(root, 3)

    params = init_params(k_param)
    x = jax.random.normal(k_input, (BATCH, C_IN, H, W), jnp.float32)  # NCHW input

    y, loss = moe_kan_conv_forward(x, params, k_noise, train=True)
    jax.block_until_ready((y, loss))

    assert y.shape == (BATCH, C_OUT, H, W)
    assert loss.shape == ()

    # Self-check against a plain-JAX f32 reference of the fused math
    # (tolerance covers the deliberate bf16 cast of the MXU inputs).
    gate_x_ref = jnp.mean(x, axis=(2, 3))
    gates_ref, _ = noisy_top_k_gating(gate_x_ref, params["w_gate"],
                                      params["w_noise"], k_noise, True)
    gate_sum_ref = gates_ref.sum(axis=1)
    conv_ref = jax.lax.conv(x, params["w_conv"], (1, 1), "SAME") \
        + params["b_conv"][None, :, None, None]
    y_ref = gate_sum_ref[:, None, None, None] * conv_ref
    max_err = float(jnp.max(jnp.abs(y - y_ref)))
    assert max_err < 5e-2, f"max abs error vs f32 reference: {max_err}"

    print("KERNEL_OK")
</pallas_src>

<mosaic_0001>
module attributes {stable_mosaic.version = 11 : i64} {
  func.func @_conv_combine_kernel(%arg0: i32, %arg1: memref<48x512xbf16, #tpu.memory_space<vmem>>, %arg2: memref<8x48xbf16, #tpu.memory_space<vmem>>, %arg3: memref<8x1xf32, #tpu.memory_space<vmem>>, %arg4: memref<1x512xf32, #tpu.memory_space<vmem>>, %arg5: memref<8x512xf32, #tpu.memory_space<vmem>>) attributes {dimension_semantics = [#tpu.dimension_semantics<parallel>], iteration_bounds = array<i64: 1>, scalar_prefetch = 0 : i64, scratch_operands = 0 : i64, tpu.core_type = #tpu.core_type<tc>, window_params = [{transform_indices = @transform_0, window_bounds = array<i64: 48, 512>}, {pipeline_mode = #tpu.pipeline_mode<synchronous>, transform_indices = @transform_1, window_bounds = array<i64: 8, 48>}, {pipeline_mode = #tpu.pipeline_mode<synchronous>, transform_indices = @transform_2, window_bounds = array<i64: 8, 1>}, {transform_indices = @transform_3, window_bounds = array<i64: 1, 512>}, {transform_indices = @transform_4, window_bounds = array<i64: 8, 512>}]} {
    %c0 = arith.constant 0 : index
    %c0_0 = arith.constant 0 : index
    %0 = vector.load %arg2[%c0, %c0_0] : memref<8x48xbf16, #tpu.memory_space<vmem>>, vector<8x48xbf16>
    %c0_1 = arith.constant 0 : index
    %c0_2 = arith.constant 0 : index
    %1 = vector.load %arg1[%c0_1, %c0_2] : memref<48x512xbf16, #tpu.memory_space<vmem>>, vector<48x512xbf16>
    %cst = arith.constant dense<0.000000e+00> : vector<8x512xf32>
    %2 = tpu.matmul %0, %1, %cst {dimension_numbers = #tpu.dot_dimension_numbers<[1], [0], [0], [1], [0, 0, 1, 1], [], []>} : vector<8x48xbf16>, vector<48x512xbf16>, vector<8x512xf32> -> vector<8x512xf32>
    %c0_3 = arith.constant 0 : index
    %c0_4 = arith.constant 0 : index
    %3 = vector.load %arg3[%c0_3, %c0_4] : memref<8x1xf32, #tpu.memory_space<vmem>>, vector<8x1xf32>
    %4 = vector.broadcast %3 : vector<8x1xf32> to vector<8x512xf32>
    %5 = arith.addf %2, %4 : vector<8x512xf32>
    %c0_5 = arith.constant 0 : index
    %c0_6 = arith.constant 0 : index
    %6 = vector.load %arg4[%c0_5, %c0_6] : memref<1x512xf32, #tpu.memory_space<vmem>>, vector<1x512xf32>
    %7 = vector.broadcast %6 : vector<1x512xf32> to vector<8x512xf32>
    %8 = arith.mulf %5, %7 : vector<8x512xf32>
    %c0_7 = arith.constant 0 : index
    %c0_8 = arith.constant 0 : index
    %9 = vector.load %arg5[%c0_7, %c0_8] : memref<8x512xf32, #tpu.memory_space<vmem>>, vector<8x512xf32>
    tpu.vector_store %arg5[%c0_7, %c0_8], %8 {strides = array<i32>} : memref<8x512xf32, #tpu.memory_space<vmem>>, vector<8x512xf32>,
    return
  }
  func.func @transform_0(%arg0: i32) -> (i32, i32) {
    %c0_i32 = arith.constant 0 : i32
    %c0_i32_0 = arith.constant 0 : i32
    return %c0_i32, %arg0 : i32, i32
  }
  func.func @transform_1(%arg0: i32) -> (i32, i32) {
    %c0_i32 = arith.constant 0 : i32
    %c0_i32_0 = arith.constant 0 : i32
    %c0_i32_1 = arith.constant 0 : i32
    return %c0_i32, %c0_i32_0 : i32, i32
  }
  func.func @transform_2(%arg0: i32) -> (i32, i32) {
    %c0_i32 = arith.constant 0 : i32
    %c0_i32_0 = arith.constant 0 : i32
    %c0_i32_1 = arith.constant 0 : i32
    return %c0_i32, %c0_i32_0 : i32, i32
  }
  func.func @transform_3(%arg0: i32) -> (i32, i32) {
    %c0_i32 = arith.constant 0 : i32
    %c0_i32_0 = arith.constant 0 : i32
    return %c0_i32, %arg0 : i32, i32
  }
  func.func @transform_4(%arg0: i32) -> (i32, i32) {
    %c0_i32 = arith.constant 0 : i32
    %c0_i32_0 = arith.constant 0 : i32
    return %c0_i32, %arg0 : i32, i32
  }
}

</mosaic_0001>

<bundles_post_ra>
// kernel: moe_kan_conv_forward.1
= control target key start
LH: loop header
LB: loop body
LE: loop exit
PB: predicated region body
PF: predicated region fallthrough
CT: control target
= control target key end

     0   :  { %v251_v1 = vmov 0   ;;  %vm97_vm0 = vcmask 392192   ;;  %v185_v15 = vlaneseq  ;;  %s334_s0 = inlined_call_operand.vmem [shape: bf16[48,512], index: 0, kind: input, shape index: {}]   ;;  %s335_s2 = inlined_call_operand.vmem [shape: f32[8,1], index: 2, kind: input, shape index: {}]   ;;  %s336_s1 = inlined_call_operand.vmem [shape: bf16[8,48], index: 1, kind: input, shape index: {}]   ;;  %s337_s3 = inlined_call_operand.vmem [shape: f32[1,512], index: 3, kind: input, shape index: {}]   ;;  %s338_s4 = inlined_call_operand.vmem [shape: f32[8,512], index: 4, kind: output, shape index: {}]  }
   0x1   :  { %v233_v0 = vld [vmem:[%s334_s0 + $0x4] ss:$16 sps:$4 sm:$0xff]   ;;  %133 = vmatprep.mubr.bf16.mxu0 %v251_v1  ;;  %174 = vmatprep.mubr.bf16.mxu1 %v251_v1  ;;  %v235_v2 = vld [vmem:[%s334_s0 + $0xc] ss:$16 sps:$4 sm:$0xff]   ;;  %v237_v3 = vld [vmem:[%s334_s0] ss:$16 sps:$4 sm:$0xff]  }
   0x2   :  { %232 = vset.pattern.permute.xlu0 %v251_v1  ;;  %101 = vmatprep.subr.bf16.mxu0 %v233_v0  ;;  %v238_v4 = vld [vmem:[%s334_s0 + $0x8] ss:$16 sps:$4 sm:$0xff]   ;;  %v239_v5 = vld [vmem:[%s334_s0 + $0x24] ss:$16 sps:$4 sm:$0xff]   ;;  %v241_v6 = vld [vmem:[%s334_s0 + $0x2c] ss:$16 sps:$4 sm:$0xff]  }
   0x3   :  { %142 = vmatprep.subr.bf16.mxu1 %v235_v2  ;;  %102 = vmatpush1.bf16.msra.mxu0 %v237_v3  ;;  %v243_v7 = vld [vmem:[%s334_s0 + $0x20] ss:$16 sps:$4 sm:$0xff]   ;;  %v244_v8 = vld [vmem:[%s334_s0 + $0x28] ss:$16 sps:$4 sm:$0xff]   ;;  %v245_v9 = vld [vmem:[%s334_s0 + $0x44] ss:$16 sps:$4 sm:$0xff]  }
   0x4   :  { %143 = vmatpush1.bf16.msra.mxu1 %v238_v4  ;;  %103 = vmatprep.subr.bf16.mxu0 %v239_v5  ;;  %v247_v10 = vld [vmem:[%s334_s0 + $0x4c] ss:$16 sps:$4 sm:$0xff]   ;;  %v249_v11 = vld [vmem:[%s334_s0 + $0x40] ss:$16 sps:$4 sm:$0xff]   ;;  %v250_v12 = vld [vmem:[%s334_s0 + $0x48] ss:$16 sps:$4 sm:$0xff]  }
   0x5   :  { %144 = vmatprep.subr.bf16.mxu1 %v241_v6  ;;  %v31_v13 = vld [vmem:[%s335_s2] sm:$0xff]  ;;  %v186_v16 = vshrl.u32 %v185_v15, 7 }
   0x6   :  { %34 = vperm.xlu0 %232, %v31_v13   ;;  %v18_v14 = vld [vmem:[%s336_s1] sm:$0xf] }
   0x7   :  { %104 = vmatpush1.bf16.msra.mxu0 %v243_v7  ;;  %v187_v17 = vsub.s32 0, %v186_v16  ;;  %v195_v18 = vsub.s32 2, %v186_v16  ;;  %v183_v19 = vld [vmem:[%s337_s3] sm:$0xf]  ;;  %v191_v20 = vsub.s32 1, %v186_v16  ;;  %v199_v21 = vsub.s32 3, %v186_v16 }
   0x8   :  { %145 = vmatpush1.bf16.msra.mxu1 %v244_v8  ;;  %105 = vmatprep.subr.bf16.mxu0 %v245_v9 }
   0x9   :  { %146 = vmatprep.subr.bf16.mxu1 %v247_v10  ;;  %v188_v23 = vrot.slane %v183_v19, %v187_v17  ;;  %v196_v24 = vrot.slane %v183_v19, %v195_v18  ;;  %v192_v27 = vrot.slane %v183_v19, %v191_v20  ;;  %v200_v28 = vrot.slane %v183_v19, %v199_v21 }
   0xb   :  { %106 = vmatpush1.bf16.msra.mxu0 %v249_v11 }
   0xc   :  { %147 = vmatpush1.bf16.msra.mxu1 %v250_v12 }
   0xe   :  { %229 = vmatmul.mubr.msk.bf16.vlgmr.msra.gmra.mrb[0].mxu0 %vm97_vm0, %v18_v14 }
   0xf   :  { %230 = vmatmul.mubr.msk.bf16.vlgmr.msra.gmra.mrb[0].mxu1 %vm97_vm0, %v18_v14 }
  0x85   :  { %v35_v22 = vpop.permute.xlu0 %34 }
  0xe1   :  { %v135_v25 = vpop.f32.mrb[0].mxu0 }
  0xe2   :  { %v176_v26 = vpop.f32.mrb[0].mxu1  ;;  %v136_v29 = vadd.f32 %v135_v25, %v35_v22  ;;  %v137_v31 = vpop.f32.mrb[1].mxu0 }
  0xe3   :  { %v177_v30 = vadd.f32 %v176_v26, %v35_v22  ;;  %v178_v32 = vpop.f32.mrb[1].mxu1  ;;  %v138_v33 = vadd.f32 %v137_v31, %v35_v22  ;;  %v139_v35 = vpop.f32.mrb[2].mxu0 }
  0xe4   :  { %v179_v34 = vadd.f32 %v178_v32, %v35_v22  ;;  %v180_v36 = vpop.f32.mrb[2].mxu1  ;;  %v205_v37 = vmul.f32 %v188_v23, %v136_v29  ;;  %v140_v39 = vpop.f32.mrb[3].mxu0 }
  0xe5   :  { %v207_v38 = vmul.f32 %v196_v24, %v177_v30  ;;  %v181_v40 = vpop.f32.mrb[3].mxu1  ;;  %v206_v41 = vmul.f32 %v192_v27, %v138_v33 }
  0xe6   :  { %v208_v42 = vmul.f32 %v200_v28, %v179_v34  ;;  %209 = vst [vmem:[%s338_s4] sm:$0xff] %v205_v37 }
  0xe7   :  { %211 = vst [vmem:[%s338_s4 + $0x10] sm:$0xff] %v207_v38  ;;  %210 = vst [vmem:[%s338_s4 + $0x8] sm:$0xff] %v206_v41 }
  0xe8   :  { %212 = vst [vmem:[%s338_s4 + $0x18] sm:$0xff] %v208_v42 }

</bundles_post_ra>
